<compile_context>
chip_gen: v7x
topology: tpu7x:2x2x1
jax: 0.10.0
libtpu: 0.0.40
codegen_flags: <defaults>
</compile_context>

<pallas_src>
import functools

import jax
import jax.numpy as jnp
import jax.scipy.linalg as jsl
from jax import lax
from jax.experimental import pallas as pl
from jax.experimental.pallas import tpu as pltpu


# x @ W.T for PyTorch nn.Linear: contract last dim of x with W's input dim (dim 1).
_LINEAR_DN = (((1,), (1,)), ((), ()))
# q @ k^T: contract the last (feature) dim of both operands — no transpose of k.
_QKT_DN = (((1,), (1,)), ((), ()))


# ----------------------------------------------------------------------------
# Fused Pallas kernel: QKV projection + attention + fc + residual broadcast
# (single invocation, whole batch resident in VMEM)
# ----------------------------------------------------------------------------
def _fused_attention_kernel(x_ref, bias_ref, wqkv_ref, bqkv_ref, wf_ref, bf_ref,
                            out_ref, *, batch, seq, dim, num_heads):
    """Single-step kernel.

    x_ref    : (B*S, 3D)  concat([q, k, v], axis=-1), batch-major rows
    bias_ref : (B, S, S)  additive mask bias (= mask * -1e9)
    wqkv_ref : (3D, 3D)   block-diag(wq, wk, wv), PyTorch (out, in) layout
    bqkv_ref : (1, 3D)    concat([bq, bk, bv])
    wf_ref   : (D, D)     fc weight (out, in); bf_ref: (1, D)
    out_ref  : (B, B, S, D) the PyTorch broadcast output out[b, j] = vp_b + fc_j
    """
    D = dim
    hd = D // num_heads
    scale = jnp.float32(1.0) / jnp.sqrt(jnp.float32(hd))

    # One fused QKV projection: (B*S, 3D) @ (3D, 3D)^T -> (B*S, 3D).
    proj = lax.dot_general(x_ref[...], wqkv_ref[...], _LINEAR_DN,
                           preferred_element_type=jnp.float32) + bqkv_ref[...]
    qp = proj[:, 0:D]          # (B*S, D)
    kp = proj[:, D:2 * D]
    vp = proj[:, 2 * D:3 * D]

    # Per-batch attention (static loops; B and H are tiny compile-time ints).
    sa_list = []
    for j in range(batch):
        rows = slice(j * seq, (j + 1) * seq)
        qj, kj, vj = qp[rows], kp[rows], vp[rows]      # (S, D) each
        bias_j = bias_ref[j]                           # (S, S)
        heads = []
        for h in range(num_heads):
            cols = slice(h * hd, (h + 1) * hd)
            qh, kh, vh = qj[:, cols], kj[:, cols], vj[:, cols]
            logits = lax.dot_general(qh, kh, _QKT_DN,
                                     preferred_element_type=jnp.float32) * scale
            logits = logits + bias_j
            logits = logits - jnp.max(logits, axis=-1, keepdims=True)
            p = jnp.exp(logits)
            attn = p / jnp.sum(p, axis=-1, keepdims=True)   # dropout = identity (eval)
            heads.append(jnp.dot(attn, vh, preferred_element_type=jnp.float32))
        sa_list.append(heads[0] if num_heads == 1 else jnp.concatenate(heads, axis=-1))
    sa = sa_list[0] if batch == 1 else jnp.concatenate(sa_list, axis=0)   # (B*S, D)

    # fc projection batched over all rows.
    fc = lax.dot_general(sa, wf_ref[...], _LINEAR_DN,
                         preferred_element_type=jnp.float32) + bf_ref[...]  # (B*S, D)

    # Residual broadcast out[b, j] = split-head v of batch b + fc of batch j,
    # formed as one tensor and written with a single store.
    vp4 = vp.reshape(batch, 1, seq, D)
    fc4 = fc.reshape(1, batch, seq, D)
    out_ref[...] = (vp4 + fc4).astype(out_ref.dtype)


# ----------------------------------------------------------------------------
# Wrapper
# ----------------------------------------------------------------------------
def self_attention_block(q, k, v, mask, params, num_heads):
    B, S, D = q.shape
    assert D % num_heads == 0
    # The module's residual broadcast (B,H,S,hd)+(B,S,D) only works for H == 1.
    assert num_heads == 1, "residual v + fc(...) only broadcasts for num_heads == 1"

    # Bake the additive mask bias once (same semantics as logits += mask*-1e9).
    bias = (mask.astype(jnp.float32) * jnp.float32(-1e9)).reshape(B, S, S)

    # Concatenate the three inputs along features and build the block-diagonal
    # QKV weight so the kernel does one wide projection matmul.
    x_cat = jnp.concatenate([q, k, v], axis=-1).reshape(B * S, 3 * D)
    w_qkv = jsl.block_diag(params["wq_w"], params["wk_w"], params["wv_w"])   # (3D, 3D)
    b_qkv = jnp.concatenate(
        [params["wq_b"], params["wk_b"], params["wv_b"]]).reshape(1, 3 * D)
    bf = params["fc_b"].reshape(1, D)

    vmem = pl.BlockSpec(memory_space=pltpu.MemorySpace.VMEM)

    out = pl.pallas_call(
        functools.partial(_fused_attention_kernel,
                          batch=B, seq=S, dim=D, num_heads=num_heads),
        out_shape=jax.ShapeDtypeStruct((B, B, S, D), jnp.float32),
        in_specs=[vmem] * 6,
        out_specs=vmem,
    )(x_cat, bias, w_qkv, b_qkv, params["fc_w"], bf)

    # TODO(synk): `output + nn.Identity(self.mlp())` is a TypeError in the
    # reference PyTorch module and is therefore omitted.
    return out


# ----------------------------------------------------------------------------
# Reference (pure JAX) + deterministic params
# ----------------------------------------------------------------------------
def _reference(q, k, v, mask, params, num_heads):
    B, S, D = q.shape
    hd = D // num_heads
    lin = lambda x, w, b: x @ w.T + b
    qp = lin(q, params["wq_w"], params["wq_b"])
    kp = lin(k, params["wk_w"], params["wk_b"])
    vp = lin(v, params["wv_w"], params["wv_b"])
    split = lambda x: x.reshape(B, S, num_heads, hd).transpose(0, 2, 1, 3)
    qh, kh, vh = split(qp), split(kp), split(vp)
    logits = jnp.einsum("bhqd,bhkd->bhqk", qh, kh) / jnp.sqrt(jnp.float32(hd))
    logits = logits + mask * jnp.float32(-1e9)
    attn = jax.nn.softmax(logits, axis=-1)
    sa = jnp.einsum("bhqk,bhkd->bhqd", attn, vh)
    sa = sa.transpose(0, 2, 1, 3).reshape(B, S, D)
    return vh + lin(sa, params["fc_w"], params["fc_b"])


def init_params(key, dim):
    keys = jax.random.split(key, 8)
    bound = 1.0 / float(jnp.sqrt(jnp.float32(dim)))
    u = lambda k, shape: jax.random.uniform(k, shape, jnp.float32, -bound, bound)
    return dict(
        wq_w=u(keys[0], (dim, dim)), wq_b=u(keys[1], (dim,)),
        wk_w=u(keys[2], (dim, dim)), wk_b=u(keys[3], (dim,)),
        wv_w=u(keys[4], (dim, dim)), wv_b=u(keys[5], (dim,)),
        fc_w=u(keys[6], (dim, dim)), fc_b=u(keys[7], (dim,)),
    )


if __name__ == "__main__":
    B, S, D, H = 2, 16, 32, 1   # H=1: the only config whose residual broadcast is valid in PyTorch
    key = jax.random.PRNGKey(0)
    kq, kk, kv, km, kp = jax.random.split(key, 5)
    q = jax.random.normal(kq, (B, S, D), jnp.float32)
    k = jax.random.normal(kk, (B, S, D), jnp.float32)
    v = jax.random.normal(kv, (B, S, D), jnp.float32)
    mask = (jax.random.uniform(km, (B, 1, S, S)) > 0.8).astype(jnp.float32)
    params = init_params(kp, D)

    out = self_attention_block(q, k, v, mask, params, num_heads=H)
    out = jax.block_until_ready(out)

    ref = _reference(q, k, v, mask, params, num_heads=H)
    assert out.shape == (B, B, S, D), out.shape   # (B,1,S,D) + (B,S,D) broadcast
    assert jnp.allclose(out, ref, atol=2e-3, rtol=2e-3), float(jnp.max(jnp.abs(out - ref)))
    print("KERNEL_OK")
</pallas_src>

<mosaic_0001>
module attributes {stable_mosaic.version = 11 : i64} {
  func.func @_fused_attention_kernel(%arg0: memref<32x96xf32, #tpu.memory_space<vmem>>, %arg1: memref<2x16x16xf32, #tpu.memory_space<vmem>>, %arg2: memref<96x96xf32, #tpu.memory_space<vmem>>, %arg3: memref<1x96xf32, #tpu.memory_space<vmem>>, %arg4: memref<32x32xf32, #tpu.memory_space<vmem>>, %arg5: memref<1x32xf32, #tpu.memory_space<vmem>>, %arg6: memref<2x2x16x32xf32, #tpu.memory_space<vmem>>) attributes {dimension_semantics = [], scalar_prefetch = 0 : i64, scratch_operands = 0 : i64, tpu.core_type = #tpu.core_type<tc>} {
    %cst = arith.constant 3.200000e+01 : f32
    %0 = math.sqrt %cst : f32
    %cst_0 = arith.constant 1.000000e+00 : f32
    %1 = arith.divf %cst_0, %0 : f32
    %c0 = arith.constant 0 : index
    %c0_1 = arith.constant 0 : index
    %2 = vector.load %arg0[%c0, %c0_1] : memref<32x96xf32, #tpu.memory_space<vmem>>, vector<32x96xf32>
    %c0_2 = arith.constant 0 : index
    %c0_3 = arith.constant 0 : index
    %3 = vector.load %arg2[%c0_2, %c0_3] : memref<96x96xf32, #tpu.memory_space<vmem>>, vector<96x96xf32>
    %cst_4 = arith.constant dense<0.000000e+00> : vector<32x96xf32>
    %4 = tpu.matmul %2, %3, %cst_4 {dimension_numbers = #tpu.dot_dimension_numbers<[1], [1], [0], [0], [0, 0, 1, 0], [], []>} : vector<32x96xf32>, vector<96x96xf32>, vector<32x96xf32> -> vector<32x96xf32>
    %c0_5 = arith.constant 0 : index
    %c0_6 = arith.constant 0 : index
    %5 = vector.load %arg3[%c0_5, %c0_6] : memref<1x96xf32, #tpu.memory_space<vmem>>, vector<1x96xf32>
    %6 = vector.broadcast %5 : vector<1x96xf32> to vector<32x96xf32>
    %7 = arith.addf %4, %6 : vector<32x96xf32>
    %8 = vector.extract_strided_slice %7 {offsets = [0, 0], sizes = [32, 32], strides = [1, 1]} : vector<32x96xf32> to vector<32x32xf32>
    %9 = vector.extract_strided_slice %7 {offsets = [0, 32], sizes = [32, 32], strides = [1, 1]} : vector<32x96xf32> to vector<32x32xf32>
    %10 = vector.extract_strided_slice %7 {offsets = [0, 64], sizes = [32, 32], strides = [1, 1]} : vector<32x96xf32> to vector<32x32xf32>
    %11 = vector.extract_strided_slice %8 {offsets = [0, 0], sizes = [16, 32], strides = [1, 1]} : vector<32x32xf32> to vector<16x32xf32>
    %12 = vector.extract_strided_slice %9 {offsets = [0, 0], sizes = [16, 32], strides = [1, 1]} : vector<32x32xf32> to vector<16x32xf32>
    %13 = vector.extract_strided_slice %10 {offsets = [0, 0], sizes = [16, 32], strides = [1, 1]} : vector<32x32xf32> to vector<16x32xf32>
    %c0_7 = arith.constant 0 : index
    %c0_8 = arith.constant 0 : index
    %c0_9 = arith.constant 0 : index
    %14 = vector.load %arg1[%c0_7, %c0_8, %c0_9] : memref<2x16x16xf32, #tpu.memory_space<vmem>>, vector<1x16x16xf32>
    %15 = vector.shape_cast %14 : vector<1x16x16xf32> to vector<16x16xf32>
    %cst_10 = arith.constant dense<0.000000e+00> : vector<16x16xf32>
    %16 = tpu.matmul %11, %12, %cst_10 {dimension_numbers = #tpu.dot_dimension_numbers<[1], [1], [0], [0], [0, 0, 1, 0], [], []>} : vector<16x32xf32>, vector<16x32xf32>, vector<16x16xf32> -> vector<16x16xf32>
    %17 = vector.broadcast %1 : f32 to vector<16x16xf32>
    %18 = arith.mulf %16, %17 : vector<16x16xf32>
    %19 = arith.addf %18, %15 : vector<16x16xf32>
    %cst_11 = arith.constant dense<0xFF800000> : vector<16xf32>
    %20 = vector.multi_reduction <maximumf>, %19, %cst_11 [1] : vector<16x16xf32> to vector<16xf32>
    %21 = vector.shape_cast %20 : vector<16xf32> to vector<16x1xf32>
    %22 = vector.broadcast %21 : vector<16x1xf32> to vector<16x16xf32>
    %23 = arith.subf %19, %22 : vector<16x16xf32>
    %24 = math.exp %23 : vector<16x16xf32>
    %cst_12 = arith.constant dense<0.000000e+00> : vector<16xf32>
    %25 = vector.multi_reduction <add>, %24, %cst_12 [1] : vector<16x16xf32> to vector<16xf32>
    %26 = vector.shape_cast %25 : vector<16xf32> to vector<16x1xf32>
    %27 = vector.broadcast %26 : vector<16x1xf32> to vector<16x16xf32>
    %28 = arith.divf %24, %27 : vector<16x16xf32>
    %cst_13 = arith.constant dense<0.000000e+00> : vector<16x32xf32>
    %29 = tpu.matmul %28, %13, %cst_13 {dimension_numbers = #tpu.dot_dimension_numbers<[1], [0], [0], [1], [0, 0, 1, 1], [], []>} : vector<16x16xf32>, vector<16x32xf32>, vector<16x32xf32> -> vector<16x32xf32>
    %30 = vector.extract_strided_slice %8 {offsets = [16, 0], sizes = [16, 32], strides = [1, 1]} : vector<32x32xf32> to vector<16x32xf32>
    %31 = vector.extract_strided_slice %9 {offsets = [16, 0], sizes = [16, 32], strides = [1, 1]} : vector<32x32xf32> to vector<16x32xf32>
    %32 = vector.extract_strided_slice %10 {offsets = [16, 0], sizes = [16, 32], strides = [1, 1]} : vector<32x32xf32> to vector<16x32xf32>
    %c1 = arith.constant 1 : index
    %c0_14 = arith.constant 0 : index
    %c0_15 = arith.constant 0 : index
    %33 = vector.load %arg1[%c1, %c0_14, %c0_15] : memref<2x16x16xf32, #tpu.memory_space<vmem>>, vector<1x16x16xf32>
    %34 = vector.shape_cast %33 : vector<1x16x16xf32> to vector<16x16xf32>
    %cst_16 = arith.constant dense<0.000000e+00> : vector<16x16xf32>
    %35 = tpu.matmul %30, %31, %cst_16 {dimension_numbers = #tpu.dot_dimension_numbers<[1], [1], [0], [0], [0, 0, 1, 0], [], []>} : vector<16x32xf32>, vector<16x32xf32>, vector<16x16xf32> -> vector<16x16xf32>
    %36 = vector.broadcast %1 : f32 to vector<16x16xf32>
    %37 = arith.mulf %35, %36 : vector<16x16xf32>
    %38 = arith.addf %37, %34 : vector<16x16xf32>
    %cst_17 = arith.constant dense<0xFF800000> : vector<16xf32>
    %39 = vector.multi_reduction <maximumf>, %38, %cst_17 [1] : vector<16x16xf32> to vector<16xf32>
    %40 = vector.shape_cast %39 : vector<16xf32> to vector<16x1xf32>
    %41 = vector.broadcast %40 : vector<16x1xf32> to vector<16x16xf32>
    %42 = arith.subf %38, %41 : vector<16x16xf32>
    %43 = math.exp %42 : vector<16x16xf32>
    %cst_18 = arith.constant dense<0.000000e+00> : vector<16xf32>
    %44 = vector.multi_reduction <add>, %43, %cst_18 [1] : vector<16x16xf32> to vector<16xf32>
    %45 = vector.shape_cast %44 : vector<16xf32> to vector<16x1xf32>
    %46 = vector.broadcast %45 : vector<16x1xf32> to vector<16x16xf32>
    %47 = arith.divf %43, %46 : vector<16x16xf32>
    %cst_19 = arith.constant dense<0.000000e+00> : vector<16x32xf32>
    %48 = tpu.matmul %47, %32, %cst_19 {dimension_numbers = #tpu.dot_dimension_numbers<[1], [0], [0], [1], [0, 0, 1, 1], [], []>} : vector<16x16xf32>, vector<16x32xf32>, vector<16x32xf32> -> vector<16x32xf32>
    %49 = tpu.concatenate %29, %48 in 0 : vector<16x32xf32>, vector<16x32xf32> -> vector<32x32xf32>
    %c0_20 = arith.constant 0 : index
    %c0_21 = arith.constant 0 : index
    %50 = vector.load %arg4[%c0_20, %c0_21] : memref<32x32xf32, #tpu.memory_space<vmem>>, vector<32x32xf32>
    %cst_22 = arith.constant dense<0.000000e+00> : vector<32x32xf32>
    %51 = tpu.matmul %49, %50, %cst_22 {dimension_numbers = #tpu.dot_dimension_numbers<[1], [1], [0], [0], [0, 0, 1, 0], [], []>} : vector<32x32xf32>, vector<32x32xf32>, vector<32x32xf32> -> vector<32x32xf32>
    %c0_23 = arith.constant 0 : index
    %c0_24 = arith.constant 0 : index
    %52 = vector.load %arg5[%c0_23, %c0_24] : memref<1x32xf32, #tpu.memory_space<vmem>>, vector<1x32xf32>
    %53 = vector.broadcast %52 : vector<1x32xf32> to vector<32x32xf32>
    %54 = arith.addf %51, %53 : vector<32x32xf32>
    %55 = vector.shape_cast %10 : vector<32x32xf32> to vector<2x1x16x32xf32>
    %56 = vector.shape_cast %54 : vector<32x32xf32> to vector<1x2x16x32xf32>
    %57 = vector.broadcast %55 : vector<2x1x16x32xf32> to vector<2x2x16x32xf32>
    %58 = vector.broadcast %56 : vector<1x2x16x32xf32> to vector<2x2x16x32xf32>
    %59 = arith.addf %57, %58 : vector<2x2x16x32xf32>
    %c0_25 = arith.constant 0 : index
    %c0_26 = arith.constant 0 : index
    %c0_27 = arith.constant 0 : index
    %c0_28 = arith.constant 0 : index
    %60 = vector.load %arg6[%c0_25, %c0_26, %c0_27, %c0_28] : memref<2x2x16x32xf32, #tpu.memory_space<vmem>>, vector<2x2x16x32xf32>
    tpu.vector_store %arg6[%c0_25, %c0_26, %c0_27, %c0_28], %59 {strides = array<i32>} : memref<2x2x16x32xf32, #tpu.memory_space<vmem>>, vector<2x2x16x32xf32>,
    return
  }
}

</mosaic_0001>

<bundles_post_ra>
// kernel: tpu_custom_call.1
= control target key start
LH: loop header
LB: loop body
LE: loop exit
PB: predicated region body
PF: predicated region fallthrough
CT: control target
= control target key end

     0   :  { %11 = vsyncpa [#allocation3], 0  ;;  %s1494_s0 = inlined_call_operand.hbm [shape: f32[32,96], index: 0, kind: input, shape index: {}]   ;;  %s1495_s1 = inlined_call_operand.hbm [shape: f32[2,16,16], index: 1, kind: input, shape index: {}]   ;;  %s1496_s2 = inlined_call_operand.hbm [shape: f32[96,96], index: 2, kind: input, shape index: {}]   ;;  %s1497_s3 = inlined_call_operand.vmem [shape: f32[1,96], index: 3, kind: input, shape index: {}]   ;;  %s1498_s4 = inlined_call_operand.hbm [shape: f32[32,32], index: 4, kind: input, shape index: {}]   ;;  %s1499_s5 = inlined_call_operand.vmem [shape: f32[1,32], index: 5, kind: input, shape index: {}]   ;;  %s1500_s6 = inlined_call_operand.hbm [shape: f32[2,2,16,32], index: 6, kind: output, shape index: {}]  }
   0x1   :  { %12 = vsyncpa [#allocation6], 0 }
   0x2   :  { %13 = vsyncpa [#allocation9], 0 }
   0x3   :  { %14 = vsyncpa [#allocation4], 0  ;;  %s1231_s21 = smov [#allocation5]   ;;  %s1232_s23 = smov [#allocation2]  }
   0x4   :  { %s32_s22 = sshll.u32 %s1231_s21, 4  ;;  %s20_s24 = sshll.u32 %s1232_s23, 4  ;;  %s33_s22 = int_to_ptr.vmem [resolvable:$true] %s32_s22  ;;  %s1275_s24 = int_to_ptr.vmem [resolvable:$true] %s20_s24 }
   0x5   :  { %s1113_s27 = scalar_lea.hbm %s1495_s1, 512 }
   0x6   :  { %p1114_p0 = scmp.ne.s32.totalorder %s1495_s1, %s1113_s27  ;;  %p1117_p1 = scmp.lt.u32.totalorder %s1113_s27, %s1495_s1 }
   0x8   :  { %p1119_p2 = pnand %p1117_p1, %p1114_p0 }
   0xa   :  { %1122 = shalt.err (!%p1119_p2)
}
   0xb   :  { %s1123_s8 = scalar_lea.vmem %s33_s22, 512  ;;  %p1128_p4 = scmp.lt.s32.totalorder %s33_s22, %s33_s22 }
   0xc   :  { %p1124_p3 = scmp.ne.s32.totalorder %s33_s22, %s1123_s8  ;;  %p1129_p5 = scmp.lt.s32.totalorder %s1123_s8, %s1123_s8 }
   0xe   :  { %p1130_p6 = por %p1129_p5, %p1128_p4 }
  0x10   :  { %p1131_p7 = pnand %p1130_p6, %p1124_p3 }
  0x12   :  { %1134 = shalt.err (!%p1131_p7)
}
  0x13   :  { %s1233_s9 = smov 128   ;;  %s1234_s10 = smov 8  }
  0x14   :  { %38 = dma.hbm_to_vmem [thread:$0]  %s1495_s1, 512, %s33_s22, [#allocation6], %s1233_s9, %s1233_s9, %s1234_s10  }
  0x15   :  { %s1135_s15 = scalar_lea.hbm %s1494_s0, 512 }
  0x16   :  { %p1136_p8 = scmp.ne.s32.totalorder %s1494_s0, %s1135_s15  ;;  %p1139_p9 = scmp.lt.u32.totalorder %s1135_s15, %s1494_s0 }
  0x18   :  { %p1141_p10 = pnand %p1139_p9, %p1136_p8 }
  0x1a   :  { %1144 = shalt.err (!%p1141_p10)
}
  0x1b   :  { %s1145_s20 = scalar_lea.vmem %s1275_s24, 512  ;;  %p1150_p12 = scmp.lt.s32.totalorder %s1275_s24, %s1275_s24 }
  0x1c   :  { %p1146_p11 = scmp.ne.s32.totalorder %s1275_s24, %s1145_s20  ;;  %p1151_p13 = scmp.lt.s32.totalorder %s1145_s20, %s1145_s20 }
  0x1e   :  { %p1152_p0 = por %p1151_p13, %p1150_p12 }
  0x20   :  { %p1153_p1 = pnand %p1152_p0, %p1146_p11 }
  0x22   :  { %1156 = shalt.err (!%p1153_p1)
}
  0x23   :  { %26 = dma.hbm_to_vmem [thread:$0]  %s1494_s0, 512, %s1275_s24, [#allocation3], %s1233_s9, %s1233_s9, %s1234_s10  }
  0x24   :  { %s1235_s22 = smov [#allocation7]   ;;  %s1236_s25 = smov [#allocation8]  }
  0x25   :  { %s44_s23 = sshll.u32 %s1235_s22, 4  ;;  %s58_s26 = sshll.u32 %s1236_s25, 4  ;;  %s45_s23 = int_to_ptr.vmem [resolvable:$true] %s44_s23  ;;  %s1312_s26 = int_to_ptr.vmem [resolvable:$true] %s58_s26 }
  0x26   :  { %s1157_s29 = scalar_lea.hbm %s1496_s2, 1536 }
  0x27   :  { %p1158_p2 = scmp.ne.s32.totalorder %s1496_s2, %s1157_s29  ;;  %p1161_p3 = scmp.lt.u32.totalorder %s1157_s29, %s1496_s2 }
  0x29   :  { %p1163_p4 = pnand %p1161_p3, %p1158_p2 }
  0x2b   :  { %1166 = shalt.err (!%p1163_p4)
}
  0x2c   :  { %s1167_s0 = scalar_lea.vmem %s45_s23, 1536  ;;  %p1172_p6 = scmp.lt.s32.totalorder %s45_s23, %s45_s23 }
  0x2d   :  { %p1168_p5 = scmp.ne.s32.totalorder %s45_s23, %s1167_s0  ;;  %p1173_p7 = scmp.lt.s32.totalorder %s1167_s0, %s1167_s0 }
  0x2f   :  { %p1174_p8 = por %p1173_p7, %p1172_p6 }
  0x31   :  { %p1175_p9 = pnand %p1174_p8, %p1168_p5 }
  0x33   :  { %1178 = shalt.err (!%p1175_p9)
}
  0x34   :  { %50 = dma.hbm_to_vmem [thread:$0]  %s1496_s2, 1536, %s45_s23, [#allocation6], %s1233_s9, %s1233_s9, %s1234_s10  }
  0x35   :  { %s1179_s15 = scalar_lea.hbm %s1498_s4, 512 }
  0x36   :  { %p1180_p10 = scmp.ne.s32.totalorder %s1498_s4, %s1179_s15  ;;  %p1183_p11 = scmp.lt.u32.totalorder %s1179_s15, %s1498_s4 }
  0x38   :  { %p1185_p12 = pnand %p1183_p11, %p1180_p10 }
  0x3a   :  { %1188 = shalt.err (!%p1185_p12)
}
  0x3b   :  { %s1189_s20 = scalar_lea.vmem %s1312_s26, 512  ;;  %p1194_p0 = scmp.lt.s32.totalorder %s1312_s26, %s1312_s26 }
  0x3c   :  { %p1190_p13 = scmp.ne.s32.totalorder %s1312_s26, %s1189_s20  ;;  %p1195_p1 = scmp.lt.s32.totalorder %s1189_s20, %s1189_s20 }
  0x3e   :  { %p1196_p2 = por %p1195_p1, %p1194_p0 }
  0x40   :  { %p1197_p3 = pnand %p1196_p2, %p1190_p13 }
  0x42   :  { %1200 = shalt.err (!%p1197_p3)
}
  0x43   :  { %64 = dma.hbm_to_vmem [thread:$0]  %s1498_s4, 512, %s1312_s26, [#allocation9], %s1233_s9, %s1233_s9, %s1234_s10  }
  0x44   :  { %1223 = dma.done.wait [#allocation3], 512  }
  0x45   :  { %1224 = vsyncadd [#allocation3], 4294966784 }
  0x46   :  { %1225 = dma.done.wait [#allocation6], 2048  }
  0x47   :  { %1226 = vsyncadd [#allocation6], 4294965248 }
  0x48   :  { %1227 = dma.done.wait [#allocation9], 512  }
  0x49   :  { %1228 = vsyncadd [#allocation9], 4294966784  ;;  %vm102_vm0 = vcmask 785408   ;;  %v83_v1 = vld [vmem:[#allocation7] sm:$0xff]  ;;  %v84_v2 = vld [vmem:[#allocation7 + $0x8] sm:$0xff]  ;;  %vm244_vm2 = vcmask 261120  }
  0x4a   :  { %vm1351_vm1 = vmpackc.low %vm102_vm0, %vm102_vm0  ;;  %v85_v3 = vld [vmem:[#allocation7 + $0x10] sm:$0xff]  ;;  %v1000_v4 = vpack.c.bf16 %v84_v2, %v83_v1  ;;  %v86_v5 = vld [vmem:[#allocation7 + $0x18] sm:$0xff]  ;;  %s1237_s22 = smov 96   ;;  %vm332_vm4 = vcmask 130048  }
  0x4b   :  { %v1006_v6 = vpack.c.bf16 %v86_v5, %v85_v3  ;;  %v79_v7 = vld [vmem:[#allocation2] sm:$0xff]  ;;  %v88_v9 = vld [vmem:[#allocation7 + $0x28] sm:$0xff]  ;;  %v89_v11 = vld [vmem:[#allocation7 + $0x30] sm:$0xff] }
  0x4c   :  { %1002 = vmatprep.subr.msk.bf16.mxu0 %vm1351_vm1, %v1000_v4  ;;  %952 = vmatprep.mubr.msk.f32.mxu0 %vm102_vm0, %v79_v7  ;;  %v87_v8 = vld [vmem:[#allocation7 + $0x20] sm:$0xff]  ;;  %v90_v12 = vld [vmem:[#allocation7 + $0x38] sm:$0xff]  ;;  %v92_v15 = vld [vmem:[#allocation7 + $0x48] sm:$0xff] }
  0x4d   :  { %1005 = vmatpush3.bf16.xpose.msk.msra.mxu0 %vm1351_vm1, %v1000_v4  ;;  %v1012_v10 = vpack.c.bf16 %v88_v9, %v87_v8  ;;  %v1018_v13 = vpack.c.bf16 %v90_v12, %v89_v11  ;;  %v91_v14 = vld [vmem:[#allocation7 + $0x40] sm:$0xff]  ;;  %v93_v17 = vld [vmem:[#allocation7 + $0x50] sm:$0xff]  ;;  %v94_v18 = vld [vmem:[#allocation7 + $0x58] sm:$0xff] }
  0x4e   :  { %1008 = vmatprep.subr.msk.bf16.mxu0 %vm1351_vm1, %v1006_v6  ;;  %v1024_v16 = vpack.c.bf16 %v92_v15, %v91_v14  ;;  %v1030_v19 = vpack.c.bf16 %v94_v18, %v93_v17  ;;  %v80_v20 = vld [vmem:[#allocation2 + $0x8] sm:$0xff]  ;;  %v850_v21 = vld [vmem:[%s1497_s3] ss:$0 sm:$0xff]  ;;  %v81_v27 = vld [vmem:[#allocation2 + $0x10] sm:$0xff]  ;;  %s1238_s3 = smov 64  }
  0x4f   :  { %v82_v28 = vld [vmem:[#allocation2 + $0x18] sm:$0xff]  ;;  %vm1397_vm3 = vmpackc.low %vm244_vm2, %vm244_vm2  ;;  %v237_v35 = vld [vmem:[#allocation5 + $0x8] sm:$0xff] }
  0x50   :  { %v236_v38 = vld [vmem:[#allocation5] sm:$0xff]  ;;  %v444_v12 = vld [vmem:[#allocation5 + $0x18] sm:$0xff]  ;;  %v443_v15 = vld [vmem:[#allocation5 + $0x10] sm:$0xff] }
  0x55   :  { %1011 = vmatpush3.bf16.xpose.msk.msra.mxu0 %vm1351_vm1, %v1006_v6 }
  0x56   :  { %1014 = vmatprep.subr.msk.bf16.mxu0 %vm1351_vm1, %v1012_v10 }
  0x5d   :  { %1017 = vmatpush3.bf16.xpose.msk.msra.mxu0 %vm1351_vm1, %v1012_v10 }
  0x5e   :  { %1020 = vmatprep.subr.msk.bf16.mxu0 %vm1351_vm1, %v1018_v13 }
  0x65   :  { %1023 = vmatpush3.bf16.xpose.msk.msra.mxu0 %vm1351_vm1, %v1018_v13 }
  0x66   :  { %1026 = vmatprep.subr.msk.bf16.mxu0 %vm1351_vm1, %v1024_v16 }
  0x6d   :  { %1029 = vmatpush3.bf16.xpose.msk.msra.mxu0 %vm1351_vm1, %v1024_v16 }
  0x6e   :  { %1032 = vmatprep.subr.msk.bf16.mxu0 %vm1351_vm1, %v1030_v19 }
  0x75   :  { %1035 = vmatpush3.bf16.xpose.msk.msra.mxu0 %vm1351_vm1, %v1030_v19 }
  0x7c   :  { %953 = vmatmul.mubr.msk.f32.vlgmr.msra.gmra.mrb[0].mxu0 %vm102_vm0, %v80_v20 }
  0x7d   :  { %955 = vmatprep.mubr.msk.f32.mxu0 %vm102_vm0, %v81_v27 }
  0x80   :  { %956 = vmatmul.mubr.msk.f32.gmra.mrb[2].mxu0 %vm102_vm0, %v82_v28 }
 0x14f   :  { %v954_v22 = vpop.f32.mrb[0].mxu0 }
 0x150   :  { %v1384_v23 = vadd.f32 %v954_v22, %v850_v21  ;;  %v217_v24 = vpop.f32.mrb[1].mxu0 }
 0x151   :  { %v1386_v25 = vadd.f32 %v850_v21, %v217_v24 }
 0x153   :  { %962 = vmatprep.mubr.msk.f32.mxu1 %vm244_vm2, %v1386_v25  ;;  %v1077_v26 = vpack.i.bf16 %v1384_v23, %v1386_v25  ;;  %v957_v44 = vpop.f32.mrb[2].mxu0 }
 0x154   :  { %v227_v45 = vpop.f32.mrb[3].mxu0  ;;  %v1412_v60 = vadd.f32 %v957_v44, %v850_v21 }
 0x155   :  { %1078 = vrot.lane.b32.xlu0 %v1077_v26, %s1237_s22  ;;  %v1414_v61 = vadd.f32 %v850_v21, %v227_v45 }
 0x157   :  { %v1087_v62 = vpack.i.bf16 %v1412_v60, %v1414_v61 }
 0x1c7   :  { %v1079_v29 = vpop.permute.xlu0 %1078 }
 0x1c8   :  { %v1081_v30 = vunpack.i.h.bf16 %v1079_v29  ;;  %v1080_v31 = vunpack.i.l.bf16 %v1079_v29 }
 0x1ca   :  { %v1036_v33 = vpack.c.bf16 %v1081_v30, %v1080_v31 }
 0x1cc   :  { %1038 = vmatprep.subr.msk.bf16.mxu1 %vm1397_vm3, %v1036_v33 }
 0x1cd   :  { %1041 = vmatpush3.bf16.xpose.msk.msra.mxu1 %vm1397_vm3, %v1036_v33 }
 0x1d4   :  { %963 = vmatmul.mubr.msk.f32.vlgmr.msra.gmra.mrb[0].mxu1 %vm244_vm2, %v1384_v23 }
 0x2a7   :  { %v964_v34 = vpop.f32.mrb[0].mxu1 }
 0x2a8   :  { %v329_v36 = vmul.f32 0.17677669, %v964_v34  ;;  %v319_v37 = vpop.f32.mrb[1].mxu1 }
 0x2a9   :  { %v328_v39 = vmul.f32 0.17677669, %v319_v37  ;;  %v647_v37 = vld [vmem:[#allocation8] sm:$0xff] }
 0x2aa   :  { %v331_v40 = vadd.f32 %v329_v36, %v237_v35 }
 0x2ab   :  { %v330_v41 = vadd.f32 %v328_v39, %v236_v38  ;;  %v648_v38 = vld [vmem:[#allocation8 + $0x8] sm:$0xff] }
 0x2ac   :  { %v336_v42 = vsel %vm332_vm4, %v331_v40, -inf }
 0x2ad   :  { %337 = vmax.xlane.f32.xlu1 %v336_v42  ;;  %v333_v43 = vsel %vm332_vm4, %v330_v41, -inf  ;;  %v1056_v42 = vpack.c.bf16 %v648_v38, %v647_v37 }
 0x2ae   :  { %334 = vmax.xlane.f32.xlu0 %v333_v43 }
 0x2be   :  { %1083 = vrot.lane.b32.xlu1 %v1077_v26, %s1238_s3 }
 0x33a   :  { %v338_v46 = vpop.xlane.xlu1 %337 }
 0x33b   :  { %v340_v47 = vsub.f32 %v331_v40, %v338_v46  ;;  %v335_v48 = vpop.xlane.xlu0 %334 }
 0x33c   :  { %v339_v49 = vsub.f32 %v330_v41, %v335_v48  ;;  %v650_v48 = vld [vmem:[#allocation8 + $0x18] sm:$0xff] }
 0x33d   :  { %v343_v50 = vmul.f32 1.442695, %v340_v47  ;;  %v649_v47 = vld [vmem:[#allocation8 + $0x10] sm:$0xff] }
 0x33e   :  { %v341_v51 = vmul.f32 1.442695, %v339_v49  ;;  %v1084_v52 = vpop.permute.xlu1 %1083  ;;  %v1062_v49 = vpack.c.bf16 %v650_v48, %v649_v47 }
 0x33f   :  { %1097 = vpow2.f32 %v343_v50  ;;  %v1086_v53 = vunpack.i.h.bf16 %v1084_v52  ;;  %v1085_v54 = vunpack.i.l.bf16 %v1084_v52  ;;  %v879_v52 = vld [vmem:[%s1499_s5] ss:$0 sm:$0xff]  ;;  %s1239_s5 = smov [#allocation10]  }
 0x340   :  { %1099 = vpow2.f32 %v341_v51  ;;  %s836_s26 = sshll.u32 %s1239_s5, 4  ;;  %s837_s26 = int_to_ptr.vmem [resolvable:$true] %s836_s26 }
 0x341   :  { %v1042_v55 = vpack.c.bf16 %v1086_v53, %v1085_v54  ;;  %s1201_s27 = scalar_lea.vmem %s837_s26, 1024  ;;  %p1206_p5 = scmp.lt.s32.totalorder %s837_s26, %s837_s26 }
 0x342   :  { %p1202_p4 = scmp.ne.s32.totalorder %s837_s26, %s1201_s27  ;;  %p1207_p6 = scmp.lt.s32.totalorder %s1201_s27, %s1201_s27 }
 0x343   :  { %1043 = vmatprep.subr.bf16.mxu1 %v1042_v55 }
 0x344   :  { %1045 = vmatpush3.bf16.msra.mxu1 %v1042_v55  ;;  %p1208_p7 = por %p1207_p6, %p1206_p5 }
 0x346   :  { %p1209_p8 = pnand %p1208_p7, %p1202_p4 }
 0x349   :  { %v1098_v56 = vpop.eup %1097 }
 0x34a   :  { %v348_v57 = vsel %vm332_vm4, %v1098_v56, 0.0  ;;  %v1100_v58 = vpop.eup %1099 }
 0x34b   :  { %349 = vadd.xlane.f32.xlu1 %v348_v57  ;;  %v345_v59 = vsel %vm332_vm4, %v1100_v58, 0.0 }
 0x34f   :  { %346 = vadd.xlane.f32.xlu1 %v345_v59 }
 0x360   :  { %1088 = vrot.lane.b32.xlu1 %v1087_v62, %s1237_s22 }
 0x3d8   :  { %v350_v63 = vpop.xlane.xlu1 %349 }
 0x3d9   :  { %1101 = vrcp.f32 %v350_v63 }
 0x3dc   :  { %v347_v0 = vpop.xlane.xlu1 %346 }
 0x3dd   :  { %1103 = vrcp.f32 %v347_v0 }
 0x3e0   :  { %v1089_v1 = vpop.permute.xlu1 %1088 }
 0x3e1   :  { %v1091_v2 = vunpack.i.h.bf16 %v1089_v1  ;;  %v1090_v3 = vunpack.i.l.bf16 %v1089_v1 }
 0x3e3   :  { %v1046_v4 = vpack.c.bf16 %v1091_v2, %v1090_v3  ;;  %v1102_v5 = vpop.eup %1101 }
 0x3e4   :  { %v354_v8 = vmul.f32 %v1102_v5, %v1098_v56 }
 0x3e5   :  { %1048 = vmatprep.subr.msk.bf16.mxu1 %vm1397_vm3, %v1046_v4 }
 0x3e7   :  { %v1104_v6 = vpop.eup %1103 }
 0x3e8   :  { %v352_v7 = vmul.f32 %v1104_v6, %v1100_v58 }
 0x3ea   :  { %969 = vmatprep.mubr.msk.f32.mxu1 %vm332_vm4, %v352_v7 }
 0x3eb   :  { %970 = vmatmul.mubr.msk.f32.vlgmr.msra.gmra.mrb[2].mxu1 %vm332_vm4, %v354_v8 }
 0x3ec   :  { %1051 = vmatpush3.bf16.xpose.msk.msra.mxu1 %vm1397_vm3, %v1046_v4  ;;  %976 = vmatprep.mubr.msk.f32.mxu1 %vm244_vm2, %v1414_v61 }
 0x3f3   :  { %977 = vmatmul.mubr.msk.f32.vlgmr.msra.gmra.mrb[4].mxu1 %vm244_vm2, %v1412_v60 }
 0x4be   :  { %v971_v9 = vpop.f32.mrb[2].mxu1 }
 0x4bf   :  { %v433_v10 = vpop.f32.mrb[3].mxu1 }
 0x4c6   :  { %v978_v11 = vpop.f32.mrb[4].mxu1 }
 0x4c7   :  { %v535_v13 = vmul.f32 0.17677669, %v978_v11  ;;  %v525_v14 = vpop.f32.mrb[5].mxu1 }
 0x4c8   :  { %v534_v16 = vmul.f32 0.17677669, %v525_v14 }
 0x4c9   :  { %v537_v17 = vadd.f32 %v535_v13, %v444_v12 }
 0x4ca   :  { %v536_v18 = vadd.f32 %v534_v16, %v443_v15 }
 0x4cb   :  { %v541_v19 = vsel %vm332_vm4, %v537_v17, -inf }
 0x4cc   :  { %542 = vmax.xlane.f32.xlu0 %v541_v19  ;;  %v538_v20 = vsel %vm332_vm4, %v536_v18, -inf }
 0x4cd   :  { %539 = vmax.xlane.f32.xlu1 %v538_v20 }
 0x559   :  { %v543_v21 = vpop.xlane.xlu0 %542 }
 0x55a   :  { %v545_v22 = vsub.f32 %v537_v17, %v543_v21  ;;  %v540_v24 = vpop.xlane.xlu1 %539 }
 0x55b   :  { %v544_v26 = vsub.f32 %v536_v18, %v540_v24 }
 0x55c   :  { %v548_v27 = vmul.f32 1.442695, %v545_v22 }
 0x55d   :  { %v546_v28 = vmul.f32 1.442695, %v544_v26 }
 0x55e   :  { %1105 = vpow2.f32 %v548_v27 }
 0x55f   :  { %1107 = vpow2.f32 %v546_v28 }
 0x568   :  { %v1106_v29 = vpop.eup %1105 }
 0x569   :  { %v553_v30 = vsel %vm332_vm4, %v1106_v29, 0.0  ;;  %v1108_v31 = vpop.eup %1107 }
 0x56a   :  { %554 = vadd.xlane.f32.xlu0 %v553_v30  ;;  %v550_v33 = vsel %vm332_vm4, %v1108_v31, 0.0 }
 0x56e   :  { %551 = vadd.xlane.f32.xlu0 %v550_v33 }
 0x584   :  { %1093 = vrot.lane.b32.xlu0 %v1087_v62, %s1238_s3 }
 0x5f7   :  { %v555_v34 = vpop.xlane.xlu0 %554 }
 0x5f8   :  { %1109 = vrcp.f32 %v555_v34 }
 0x5fb   :  { %v552_v35 = vpop.xlane.xlu0 %551 }
 0x5fc   :  { %1111 = vrcp.f32 %v552_v35 }
 0x5ff   :  { %v1094_v36 = vpop.permute.xlu0 %1093 }
 0x600   :  { %v1096_v39 = vunpack.i.h.bf16 %v1094_v36  ;;  %v1095_v40 = vunpack.i.l.bf16 %v1094_v36 }
 0x602   :  { %v1052_v41 = vpack.c.bf16 %v1096_v39, %v1095_v40  ;;  %v1110_v43 = vpop.eup %1109 }
 0x603   :  { %v559_v46 = vmul.f32 %v1110_v43, %v1106_v29 }
 0x604   :  { %1053 = vmatprep.subr.bf16.mxu1 %v1052_v41 }
 0x605   :  { %1055 = vmatpush3.bf16.msra.mxu1 %v1052_v41 }
 0x606   :  { %v1112_v44 = vpop.eup %1111  ;;  %1058 = vmatprep.subr.msk.bf16.mxu1 %vm1397_vm3, %v1056_v42 }
 0x607   :  { %v557_v45 = vmul.f32 %v1112_v44, %v1108_v31 }
 0x609   :  { %983 = vmatprep.mubr.msk.f32.mxu1 %vm332_vm4, %v557_v45 }
 0x60a   :  { %984 = vmatmul.mubr.msk.f32.vlgmr.msra.gmra.mrb[6].mxu1 %vm332_vm4, %v559_v46 }
 0x60b   :  { %994 = vmatprep.mubr.msk.f32.mxu1 %vm244_vm2, %v433_v10 }
 0x60e   :  { %1061 = vmatpush3.bf16.xpose.msk.msra.mxu1 %vm1397_vm3, %v1056_v42 }
 0x60f   :  { %1064 = vmatprep.subr.msk.bf16.mxu1 %vm1397_vm3, %v1062_v49 }
 0x616   :  { %1067 = vmatpush3.bf16.xpose.msk.msra.mxu1 %vm1397_vm3, %v1062_v49 }
 0x61d   :  { %995 = vmatmul.mubr.msk.f32.vlgmr.msra.gmra.mrb[8].mxu1 %vm244_vm2, %v971_v9 }
 0x6dd   :  { %v985_v50 = vpop.f32.mrb[6].mxu1 }
 0x6de   :  { %v638_v51 = vpop.f32.mrb[7].mxu1 }
 0x6df   :  { %997 = vmatprep.mubr.msk.f32.mxu1 %vm244_vm2, %v638_v51 }
 0x6e0   :  { %998 = vmatmul.mubr.msk.f32.gmra.mrb[10].mxu1 %vm244_vm2, %v985_v50 }
 0x6f0   :  { %v996_v53 = vpop.f32.mrb[8].mxu1 }
 0x6f1   :  { %v754_v54 = vadd.f32 %v996_v53, %v879_v52  ;;  %v748_v55 = vpop.f32.mrb[9].mxu1 }
 0x6f2   :  { %v749_v56 = vadd.f32 %v879_v52, %v748_v55 }
 0x6f3   :  { %773 = vrot.lane.b32.xlu1 %v754_v54, %s1238_s3 }
 0x6f4   :  { %771 = vrot.lane.b32.xlu0 %v749_v56, %s1238_s3 }
 0x765   :  { %v774_v1 = vpop.permute.xlu1 %773 }
 0x766   :  { %v772_v32 = vpop.permute.xlu0 %771  ;;  %v784_v2 = vadd.f32 %v774_v1, %v1384_v23  ;;  %v788_v3 = vadd.f32 %v774_v1, %v1412_v60 }
 0x767   :  { %v787_v57 = vadd.f32 %v772_v32, %v1414_v61  ;;  %v783_v0 = vadd.f32 %v772_v32, %v1386_v25 }
 0x769   :  { %807 = vrot.lane.b32.xlu1 %v787_v57, %s1238_s3 }
 0x7b3   :  { %v999_v58 = vpop.f32.mrb[10].mxu1 }
 0x7b4   :  { %v758_v59 = vpop.f32.mrb[11].mxu1  ;;  %v764_v63 = vadd.f32 %v999_v58, %v879_v52 }
 0x7b5   :  { %v759_v62 = vadd.f32 %v879_v52, %v758_v59 }
 0x7b7   :  { %775 = vrot.lane.b32.xlu0 %v759_v62, %s1238_s3 }
 0x7bb   :  { %777 = vrot.lane.b32.xlu0 %v764_v63, %s1238_s3 }
 0x7bf   :  { %799 = vrot.lane.b32.xlu0 %v783_v0, %s1238_s3 }
 0x7c3   :  { %801 = vrot.lane.b32.xlu0 %v784_v2, %s1238_s3 }
 0x7c7   :  { %809 = vrot.lane.b32.xlu0 %v788_v3, %s1238_s3 }
 0x7db   :  { %v808_v4 = vpop.permute.xlu1 %807 }
 0x7dc   :  { %827 = vst.msk [vmem:[#allocation10 + $0x20] sm:$0xff] %vm244_vm2, %v808_v4 }
 0x829   :  { %v776_v5 = vpop.permute.xlu0 %775 }
 0x82a   :  { %v785_v6 = vadd.f32 %v776_v5, %v1386_v25  ;;  %v789_v8 = vadd.f32 %v776_v5, %v1414_v61 }
 0x82c   :  { %803 = vrot.lane.b32.xlu1 %v785_v6, %s1238_s3 }
 0x82d   :  { %v778_v7 = vpop.permute.xlu0 %777 }
 0x82e   :  { %v786_v9 = vadd.f32 %v778_v7, %v1384_v23  ;;  %v790_v11 = vadd.f32 %v778_v7, %v1412_v60 }
 0x830   :  { %811 = vrot.lane.b32.xlu1 %v789_v8, %s1238_s3  ;;  %805 = vrot.lane.b32.xlu0 %v786_v9, %s1238_s3 }
 0x831   :  { %v800_v10 = vpop.permute.xlu0 %799 }
 0x832   :  { %823 = vst.msk [vmem:[#allocation10] sm:$0xff] %vm244_vm2, %v800_v10 }
 0x834   :  { %813 = vrot.lane.b32.xlu0 %v790_v11, %s1238_s3 }
 0x835   :  { %v802_v12 = vpop.permute.xlu0 %801 }
 0x836   :  { %824 = vst.msk [vmem:[#allocation10 + $0x8] sm:$0xff] %vm244_vm2, %v802_v12 }
 0x839   :  { %v810_v25 = vpop.permute.xlu0 %809 }
 0x83a   :  { %828 = vst.msk [vmem:[#allocation10 + $0x28] sm:$0xff] %vm244_vm2, %v810_v25 }
 0x89e   :  { %v804_v61 = vpop.permute.xlu1 %803 }
 0x89f   :  { %825 = vst.msk [vmem:[#allocation10 + $0x10] sm:$0xff] %vm244_vm2, %v804_v61 }
 0x8a2   :  { %v812_v23 = vpop.permute.xlu1 %811  ;;  %v806_v13 = vpop.permute.xlu0 %805 }
 0x8a3   :  { %829 = vst.msk [vmem:[#allocation10 + $0x30] sm:$0xff] %vm244_vm2, %v812_v23  ;;  %826 = vst.msk [vmem:[#allocation10 + $0x18] sm:$0xff] %vm244_vm2, %v806_v13 }
 0x8a6   :  { %v814_v60 = vpop.permute.xlu0 %813 }
 0x8a7   :  { %830 = vst.msk [vmem:[#allocation10 + $0x38] sm:$0xff] %vm244_vm2, %v814_v60 }
 0x8a8   :  { %1212 = shalt.err (!%p1209_p8)
}
 0x8a9   :  { %s1213_s30 = scalar_lea.hbm %s1500_s6, 1024 }
 0x8aa   :  { %p1214_p9 = scmp.ne.s32.totalorder %s1500_s6, %s1213_s30  ;;  %p1217_p10 = scmp.lt.u32.totalorder %s1213_s30, %s1500_s6 }
 0x8ac   :  { %p1219_p11 = pnand %p1217_p10, %p1214_p9 }
 0x8ae   :  { %1222 = shalt.err (!%p1219_p11)
}
 0x8af   :  { %842 = dma.vmem_to_hbm [thread:$0]  %s837_s26, 1024, %s1500_s6, [#allocation4], %s1233_s9, %s1233_s9, %s1234_s10  }
 0x8b0   :  { %1229 = dma.done.wait [#allocation4], 1024  }
 0x8b1   :  { %1230 = vsyncadd [#allocation4], 4294966272 }
 0x8b2   :  { %846 = vsyncpa [#allocation3], 1 }
 0x8b3   :  { %847 = vsyncpa [#allocation6], 1 }
 0x8b4   :  { %848 = vsyncpa [#allocation9], 1 }
 0x8b5   :  { %849 = vsyncpa [#allocation4], 1 }

</bundles_post_ra>
